<compile_context>
chip_gen: v7x
topology: tpu7x:2x2x1
jax: 0.10.0
libtpu: 0.0.40
codegen_flags: <defaults>
</compile_context>

<pallas_src>
import functools

import jax
import jax.numpy as jnp
from jax.experimental import pallas as pl
from jax.experimental.pallas import tpu as pltpu

_LANE = 128
_SUBLANE = 8
_NEG_LARGE = -3.0e38                 # sentinel for padded fc1 bias lanes
_VMEM_STREAM_BUDGET = 36 << 20       # bytes for pipelined x/out double buffers


def _round_up(n, m):
    return ((n + m - 1) // m) * m


def pack_params(w1, b1, w2, b2):
    """One-time parameter packing (hoisted out of the per-call path).

    Pads I and C to the 128-lane width, casts the fc1 weight to bf16 and splits
    the f32 fc2 weight into hi/lo bf16 planes for two near-exact bf16 MXU passes.
    """
    F, I = w1.shape
    C = w2.shape[1]
    i_pad = _round_up(I, _LANE)
    c_pad = _round_up(C, _LANE)

    w1_p = jnp.zeros((F, i_pad), jnp.bfloat16).at[:, :I].set(w1.astype(jnp.bfloat16))
    # Padded fc1 bias lanes get a large negative sentinel -> never win argmax.
    b1_p = jnp.full((1, i_pad), _NEG_LARGE, jnp.float32).at[:, :I].set(
        jnp.reshape(b1, (1, I)).astype(jnp.float32))

    w2_f = jnp.zeros((i_pad, c_pad), jnp.float32).at[:I, :C].set(w2.astype(jnp.float32))
    w2_hi = w2_f.astype(jnp.bfloat16)
    w2_lo = (w2_f - w2_hi.astype(jnp.float32)).astype(jnp.bfloat16)
    b2_p = jnp.zeros((1, c_pad), jnp.float32).at[:, :C].set(
        jnp.reshape(b2, (1, C)).astype(jnp.float32))

    return {"w1": w1_p, "b1": b1_p, "w2_hi": w2_hi, "w2_lo": w2_lo, "b2": b2_p,
            "num_classes": C}


def _two_layer_fixed_kernel(x_ref, w1_ref, b1_ref, w2_hi_ref, w2_lo_ref, b2_ref,
                            out_ref):
    # fc1: cast x to bf16 in VMEM (x was streamed from HBM in f32 exactly once),
    # one bf16 MXU pass with f32 accumulation, f32 bias add.
    x_bf = x_ref[...].astype(jnp.bfloat16)
    h = jnp.dot(x_bf, w1_ref[...], preferred_element_type=jnp.float32) + b1_ref[...]

    # argmax over the lane axis with torch tie-breaking (first max index).
    m = jnp.max(h, axis=1, keepdims=True)                    # (TB, 1)
    iota = jax.lax.broadcasted_iota(jnp.int32, h.shape, 1)   # (TB, I_pad)
    masked_iota = jnp.where(h == m, iota, jnp.int32(h.shape[1]))
    idx = jnp.min(masked_iota, axis=1, keepdims=True)        # (TB, 1)

    # fc2: one-hot row gather of w2 as two bf16 MXU passes (hi/lo split of the
    # f32 weight -> near-exact), f32 accumulation, f32 bias.
    onehot = (iota == idx).astype(jnp.bfloat16)              # exact 0.0 / 1.0
    out = jnp.dot(onehot, w2_hi_ref[...], preferred_element_type=jnp.float32)
    out = out + jnp.dot(onehot, w2_lo_ref[...], preferred_element_type=jnp.float32)
    out_ref[...] = out + b2_ref[...]


def _weight_spec(shape, single_buffer):
    """Constant-index_map BlockSpec; single-buffered when the API allows it."""
    index_map = lambda i: (0,) * len(shape)
    if single_buffer and hasattr(pl, "Buffered"):
        try:
            return pl.BlockSpec(shape, index_map, pipeline_mode=pl.Buffered(1))
        except Exception:  # pipeline_mode / Buffered(1) not available here
            pass
    return pl.BlockSpec(shape, index_map)


@functools.partial(jax.jit, static_argnames=("tb", "single_buffer_weights"))
def _forward(x, w1, b1, w2_hi, w2_lo, b2, *, tb, single_buffer_weights):
    B, F = x.shape
    i_pad = w1.shape[1]
    c_pad = w2_hi.shape[1]
    grid = (pl.cdiv(B, tb),)

    # Explicit VMEM budget (covers v5e's 16 MiB default scoped limit and keeps
    # within v7x's 64 MiB physical VMEM).
    buf_factor = 1 if single_buffer_weights else 2
    weight_bytes = buf_factor * (F * i_pad * 2            # w1 bf16
                                 + _SUBLANE * i_pad * 4   # b1 f32 (sublane-padded)
                                 + 2 * i_pad * c_pad * 2  # w2 hi/lo bf16
                                 + _SUBLANE * c_pad * 4)  # b2 f32
    stream_bytes = 2 * tb * F * 4 + 2 * tb * c_pad * 4    # x / out double buffers
    vmem_limit = int(min(max(weight_bytes + stream_bytes + (8 << 20), 32 << 20),
                         64 << 20))

    return pl.pallas_call(
        _two_layer_fixed_kernel,
        out_shape=jax.ShapeDtypeStruct((B, c_pad), jnp.float32),
        grid=grid,
        in_specs=[
            pl.BlockSpec((tb, F), lambda i: (i, 0)),            # x tile (pipelined)
            _weight_spec((F, i_pad), single_buffer_weights),    # w1 (resident)
            _weight_spec((1, i_pad), single_buffer_weights),    # b1 (resident)
            _weight_spec((i_pad, c_pad), single_buffer_weights),  # w2 hi (resident)
            _weight_spec((i_pad, c_pad), single_buffer_weights),  # w2 lo (resident)
            _weight_spec((1, c_pad), single_buffer_weights),    # b2 (resident)
        ],
        out_specs=pl.BlockSpec((tb, c_pad), lambda i: (i, 0)),  # lane-dense store
        compiler_params=pltpu.CompilerParams(
            dimension_semantics=("parallel",),
            vmem_limit_bytes=vmem_limit,
        ),
    )(x, w1, b1, w2_hi, w2_lo, b2)


def two_layer_fixed_classifier(x, packed, *, batch_tile=512):
    """x: (B, F) f32; packed: output of pack_params(). Returns (B, C) f32."""
    B, F = x.shape
    c_pad = packed["w2_hi"].shape[1]
    C = packed["num_classes"]

    # Batch tile: multiple of 8 sublanes; at least 2 grid steps when B allows
    # it (so both v7x TensorCores get work); capped by the VMEM stream budget.
    tb = min(batch_tile, max(_SUBLANE, _round_up(pl.cdiv(B, 2), _SUBLANE)))
    per_row_bytes = 2 * 4 * (F + c_pad)  # double-buffered f32 x row + f32 out row
    tb_vmem_cap = max(_SUBLANE,
                      (_VMEM_STREAM_BUDGET // per_row_bytes) // _SUBLANE * _SUBLANE)
    tb = _round_up(min(tb, tb_vmem_cap), _SUBLANE)
    # TODO(synk): for very large F (resident w1 stripe no longer fits VMEM even
    # at tb=8) add a K grid axis over F with an f32 VMEM accumulator.

    x = x.astype(jnp.float32)
    args = (x, packed["w1"], packed["b1"], packed["w2_hi"], packed["w2_lo"],
            packed["b2"])
    try:
        out = _forward(*args, tb=tb, single_buffer_weights=True)
    except Exception:
        # pipeline_mode=pl.Buffered(1) not supported by this Pallas build;
        # fall back to default double-buffered weights.
        out = _forward(*args, tb=tb, single_buffer_weights=False)
    return out[:B, :C]


def _reference(x, w1, b1, w2, b2):
    # Mirrors the kernel's fc1 precision (bf16 operands, f32 accumulation) so
    # the argmax index is compared apples-to-apples; fc2 stays in f32.
    h = jnp.dot(x.astype(jnp.bfloat16), w1.astype(jnp.bfloat16),
                preferred_element_type=jnp.float32) + b1
    idx = jnp.argmax(h, axis=1)
    onehot = jax.nn.one_hot(idx, w1.shape[1], dtype=jnp.float32)
    return onehot @ w2 + b2


if __name__ == "__main__":
    # Small shapes consistent with the module: num_feat=32, num_intermed=16, num_cls=8.
    B, NUM_FEAT, NUM_INTERMED, NUM_CLS = 8, 32, 16, 8

    key = jax.random.PRNGKey(0)
    kx, k1, kb1, k2, kb2 = jax.random.split(key, 5)

    x = jax.random.normal(kx, (B, NUM_FEAT), dtype=jnp.float32)

    # Deterministic synthetic nn.Linear-style parameters (stored transposed).
    bound1 = 1.0 / (NUM_FEAT ** 0.5)
    w1 = jax.random.uniform(k1, (NUM_FEAT, NUM_INTERMED), jnp.float32, -bound1, bound1)
    b1 = jax.random.uniform(kb1, (1, NUM_INTERMED), jnp.float32, -bound1, bound1)

    bound2 = 1.0 / (NUM_INTERMED ** 0.5)
    w2 = jax.random.uniform(k2, (NUM_INTERMED, NUM_CLS), jnp.float32, -bound2, bound2)
    b2 = jax.random.uniform(kb2, (1, NUM_CLS), jnp.float32, -bound2, bound2)

    packed = pack_params(w1, b1, w2, b2)      # one-time packing (not per call)
    out = two_layer_fixed_classifier(x, packed)
    out = jax.block_until_ready(out)

    ref = _reference(x, w1, b1, w2, b2)
    assert out.shape == (B, NUM_CLS)
    assert jnp.allclose(out, ref, atol=1e-5, rtol=1e-5), "mismatch vs pure-JAX reference"

    print("KERNEL_OK")
</pallas_src>

<mosaic_0001>
module attributes {stable_mosaic.version = 11 : i64} {
  func.func @_two_layer_fixed_kernel(%arg0: i32, %arg1: memref<8x32xf32, #tpu.memory_space<vmem>>, %arg2: memref<32x128xbf16, #tpu.memory_space<vmem>>, %arg3: memref<1x128xf32, #tpu.memory_space<vmem>>, %arg4: memref<128x128xbf16, #tpu.memory_space<vmem>>, %arg5: memref<128x128xbf16, #tpu.memory_space<vmem>>, %arg6: memref<1x128xf32, #tpu.memory_space<vmem>>, %arg7: memref<8x128xf32, #tpu.memory_space<vmem>>) attributes {dimension_semantics = [#tpu.dimension_semantics<parallel>], iteration_bounds = array<i64: 1>, scalar_prefetch = 0 : i64, scratch_operands = 0 : i64, tpu.core_type = #tpu.core_type<tc>, window_params = [{transform_indices = @transform_0, window_bounds = array<i64: 8, 32>}, {pipeline_mode = #tpu.pipeline_mode<synchronous>, transform_indices = @transform_1, window_bounds = array<i64: 32, 128>}, {pipeline_mode = #tpu.pipeline_mode<synchronous>, transform_indices = @transform_2, window_bounds = array<i64: 1, 128>}, {pipeline_mode = #tpu.pipeline_mode<synchronous>, transform_indices = @transform_3, window_bounds = array<i64: 128, 128>}, {pipeline_mode = #tpu.pipeline_mode<synchronous>, transform_indices = @transform_4, window_bounds = array<i64: 128, 128>}, {pipeline_mode = #tpu.pipeline_mode<synchronous>, transform_indices = @transform_5, window_bounds = array<i64: 1, 128>}, {transform_indices = @transform_6, window_bounds = array<i64: 8, 128>}]} {
    %c0 = arith.constant 0 : index
    %c0_0 = arith.constant 0 : index
    %0 = vector.load %arg1[%c0, %c0_0] : memref<8x32xf32, #tpu.memory_space<vmem>>, vector<8x32xf32>
    %1 = arith.truncf %0 : vector<8x32xf32> to vector<8x32xbf16>
    %c0_1 = arith.constant 0 : index
    %c0_2 = arith.constant 0 : index
    %2 = vector.load %arg2[%c0_1, %c0_2] : memref<32x128xbf16, #tpu.memory_space<vmem>>, vector<32x128xbf16>
    %cst = arith.constant dense<0.000000e+00> : vector<8x128xf32>
    %3 = tpu.matmul %1, %2, %cst {dimension_numbers = #tpu.dot_dimension_numbers<[1], [0], [0], [1], [0, 0, 1, 1], [], []>} : vector<8x32xbf16>, vector<32x128xbf16>, vector<8x128xf32> -> vector<8x128xf32>
    %c0_3 = arith.constant 0 : index
    %c0_4 = arith.constant 0 : index
    %4 = vector.load %arg3[%c0_3, %c0_4] : memref<1x128xf32, #tpu.memory_space<vmem>>, vector<1x128xf32>
    %5 = vector.broadcast %4 : vector<1x128xf32> to vector<8x128xf32>
    %6 = arith.addf %3, %5 : vector<8x128xf32>
    %cst_5 = arith.constant dense<0xFF800000> : vector<8xf32>
    %7 = vector.multi_reduction <maximumf>, %6, %cst_5 [1] : vector<8x128xf32> to vector<8xf32>
    %8 = vector.shape_cast %7 : vector<8xf32> to vector<8x1xf32>
    %9 = tpu.iota {dimensions = array<i32: 1>} : vector<8x128xi32>
    %10 = vector.broadcast %8 : vector<8x1xf32> to vector<8x128xf32>
    %11 = arith.cmpf oeq, %6, %10 : vector<8x128xf32>
    %c128_i32 = arith.constant 128 : i32
    %12 = vector.broadcast %c128_i32 : i32 to vector<8x128xi32>
    %13 = arith.select %11, %9, %12 : vector<8x128xi1>, vector<8x128xi32>
    %cst_6 = arith.constant dense<2147483647> : vector<8xi32>
    %14 = vector.multi_reduction <minsi>, %13, %cst_6 [1] : vector<8x128xi32> to vector<8xi32>
    %15 = vector.shape_cast %14 : vector<8xi32> to vector<8x1xi32>
    %16 = vector.broadcast %15 : vector<8x1xi32> to vector<8x128xi32>
    %17 = arith.cmpi eq, %9, %16 : vector<8x128xi32>
    %18 = arith.extui %17 : vector<8x128xi1> to vector<8x128xi32>
    %19 = arith.sitofp %18 : vector<8x128xi32> to vector<8x128xf32>
    %20 = arith.truncf %19 : vector<8x128xf32> to vector<8x128xbf16>
    %c0_7 = arith.constant 0 : index
    %c0_8 = arith.constant 0 : index
    %21 = vector.load %arg4[%c0_7, %c0_8] : memref<128x128xbf16, #tpu.memory_space<vmem>>, vector<128x128xbf16>
    %cst_9 = arith.constant dense<0.000000e+00> : vector<8x128xf32>
    %22 = tpu.matmul %20, %21, %cst_9 {dimension_numbers = #tpu.dot_dimension_numbers<[1], [0], [0], [1], [0, 0, 1, 1], [], []>} : vector<8x128xbf16>, vector<128x128xbf16>, vector<8x128xf32> -> vector<8x128xf32>
    %c0_10 = arith.constant 0 : index
    %c0_11 = arith.constant 0 : index
    %23 = vector.load %arg5[%c0_10, %c0_11] : memref<128x128xbf16, #tpu.memory_space<vmem>>, vector<128x128xbf16>
    %cst_12 = arith.constant dense<0.000000e+00> : vector<8x128xf32>
    %24 = tpu.matmul %20, %23, %cst_12 {dimension_numbers = #tpu.dot_dimension_numbers<[1], [0], [0], [1], [0, 0, 1, 1], [], []>} : vector<8x128xbf16>, vector<128x128xbf16>, vector<8x128xf32> -> vector<8x128xf32>
    %25 = arith.addf %22, %24 : vector<8x128xf32>
    %c0_13 = arith.constant 0 : index
    %c0_14 = arith.constant 0 : index
    %26 = vector.load %arg6[%c0_13, %c0_14] : memref<1x128xf32, #tpu.memory_space<vmem>>, vector<1x128xf32>
    %27 = vector.broadcast %26 : vector<1x128xf32> to vector<8x128xf32>
    %28 = arith.addf %25, %27 : vector<8x128xf32>
    %c0_15 = arith.constant 0 : index
    %c0_16 = arith.constant 0 : index
    %29 = vector.load %arg7[%c0_15, %c0_16] : memref<8x128xf32, #tpu.memory_space<vmem>>, vector<8x128xf32>
    tpu.vector_store %arg7[%c0_15, %c0_16], %28 {strides = array<i32>} : memref<8x128xf32, #tpu.memory_space<vmem>>, vector<8x128xf32>,
    return
  }
  func.func @transform_0(%arg0: i32) -> (i32, i32) {
    %c0_i32 = arith.constant 0 : i32
    %c0_i32_0 = arith.constant 0 : i32
    return %arg0, %c0_i32 : i32, i32
  }
  func.func @transform_1(%arg0: i32) -> (i32, i32) {
    %c0_i32 = arith.constant 0 : i32
    %c0_i32_0 = arith.constant 0 : i32
    %c0_i32_1 = arith.constant 0 : i32
    return %c0_i32, %c0_i32_0 : i32, i32
  }
  func.func @transform_2(%arg0: i32) -> (i32, i32) {
    %c0_i32 = arith.constant 0 : i32
    %c0_i32_0 = arith.constant 0 : i32
    %c0_i32_1 = arith.constant 0 : i32
    return %c0_i32, %c0_i32_0 : i32, i32
  }
  func.func @transform_3(%arg0: i32) -> (i32, i32) {
    %c0_i32 = arith.constant 0 : i32
    %c0_i32_0 = arith.constant 0 : i32
    %c0_i32_1 = arith.constant 0 : i32
    return %c0_i32, %c0_i32_0 : i32, i32
  }
  func.func @transform_4(%arg0: i32) -> (i32, i32) {
    %c0_i32 = arith.constant 0 : i32
    %c0_i32_0 = arith.constant 0 : i32
    %c0_i32_1 = arith.constant 0 : i32
    return %c0_i32, %c0_i32_0 : i32, i32
  }
  func.func @transform_5(%arg0: i32) -> (i32, i32) {
    %c0_i32 = arith.constant 0 : i32
    %c0_i32_0 = arith.constant 0 : i32
    %c0_i32_1 = arith.constant 0 : i32
    return %c0_i32, %c0_i32_0 : i32, i32
  }
  func.func @transform_6(%arg0: i32) -> (i32, i32) {
    %c0_i32 = arith.constant 0 : i32
    %c0_i32_0 = arith.constant 0 : i32
    return %arg0, %c0_i32 : i32, i32
  }
}

module attributes {stable_mosaic.version = 11 : i64} {
  func.func @_two_layer_fixed_kernel(%arg0: i32, %arg1: memref<8x32xf32, #tpu.memory_space<vmem>>, %arg2: memref<32x128xbf16, #tpu.memory_space<vmem>>, %arg3: memref<1x128xf32, #tpu.memory_space<vmem>>, %arg4: memref<128x128xbf16, #tpu.memory_space<vmem>>, %arg5: memref<128x128xbf16, #tpu.memory_space<vmem>>, %arg6: memref<1x128xf32, #tpu.memory_space<vmem>>, %arg7: memref<8x128xf32, #tpu.memory_space<vmem>>) attributes {dimension_semantics = [#tpu.dimension_semantics<parallel>], iteration_bounds = array<i64: 1>, scalar_prefetch = 0 : i64, scratch_operands = 0 : i64, tpu.core_type = #tpu.core_type<tc>, window_params = [{transform_indices = @transform_0, window_bounds = array<i64: 8, 32>}, {pipeline_mode = #tpu.pipeline_mode<synchronous>, transform_indices = @transform_1, window_bounds = array<i64: 32, 128>}, {pipeline_mode = #tpu.pipeline_mode<synchronous>, transform_indices = @transform_2, window_bounds = array<i64: 1, 128>}, {pipeline_mode = #tpu.pipeline_mode<synchronous>, transform_indices = @transform_3, window_bounds = array<i64: 128, 128>}, {pipeline_mode = #tpu.pipeline_mode<synchronous>, transform_indices = @transform_4, window_bounds = array<i64: 128, 128>}, {pipeline_mode = #tpu.pipeline_mode<synchronous>, transform_indices = @transform_5, window_bounds = array<i64: 1, 128>}, {transform_indices = @transform_6, window_bounds = array<i64: 8, 128>}]} {
    %c0 = arith.constant 0 : index
    %c0_0 = arith.constant 0 : index
    %0 = vector.load %arg1[%c0, %c0_0] : memref<8x32xf32, #tpu.memory_space<vmem>>, vector<8x32xf32>
    %1 = arith.truncf %0 : vector<8x32xf32> to vector<8x32xbf16>
    %c0_1 = arith.constant 0 : index
    %c0_2 = arith.constant 0 : index
    %2 = vector.load %arg2[%c0_1, %c0_2] : memref<32x128xbf16, #tpu.memory_space<vmem>>, vector<32x128xbf16>
    %cst = arith.constant dense<0.000000e+00> : vector<8x128xf32>
    %3 = tpu.matmul %1, %2, %cst {dimension_numbers = #tpu.dot_dimension_numbers<[1], [0], [0], [1], [0, 0, 1, 1], [], []>} : vector<8x32xbf16>, vector<32x128xbf16>, vector<8x128xf32> -> vector<8x128xf32>
    %c0_3 = arith.constant 0 : index
    %c0_4 = arith.constant 0 : index
    %4 = vector.load %arg3[%c0_3, %c0_4] : memref<1x128xf32, #tpu.memory_space<vmem>>, vector<1x128xf32>
    %5 = vector.broadcast %4 : vector<1x128xf32> to vector<8x128xf32>
    %6 = arith.addf %3, %5 : vector<8x128xf32>
    %cst_5 = arith.constant dense<0xFF800000> : vector<8xf32>
    %7 = vector.multi_reduction <maximumf>, %6, %cst_5 [1] : vector<8x128xf32> to vector<8xf32>
    %8 = vector.shape_cast %7 : vector<8xf32> to vector<8x1xf32>
    %9 = tpu.iota {dimensions = array<i32: 1>} : vector<8x128xi32>
    %10 = vector.broadcast %8 : vector<8x1xf32> to vector<8x128xf32>
    %11 = arith.cmpf oeq, %6, %10 : vector<8x128xf32>
    %c128_i32 = arith.constant 128 : i32
    %12 = vector.broadcast %c128_i32 : i32 to vector<8x128xi32>
    %13 = arith.select %11, %9, %12 : vector<8x128xi1>, vector<8x128xi32>
    %cst_6 = arith.constant dense<2147483647> : vector<8xi32>
    %14 = vector.multi_reduction <minsi>, %13, %cst_6 [1] : vector<8x128xi32> to vector<8xi32>
    %15 = vector.shape_cast %14 : vector<8xi32> to vector<8x1xi32>
    %16 = vector.broadcast %15 : vector<8x1xi32> to vector<8x128xi32>
    %17 = arith.cmpi eq, %9, %16 : vector<8x128xi32>
    %18 = arith.extui %17 : vector<8x128xi1> to vector<8x128xi32>
    %19 = arith.sitofp %18 : vector<8x128xi32> to vector<8x128xf32>
    %20 = arith.truncf %19 : vector<8x128xf32> to vector<8x128xbf16>
    %c0_7 = arith.constant 0 : index
    %c0_8 = arith.constant 0 : index
    %21 = vector.load %arg4[%c0_7, %c0_8] : memref<128x128xbf16, #tpu.memory_space<vmem>>, vector<128x128xbf16>
    %cst_9 = arith.constant dense<0.000000e+00> : vector<8x128xf32>
    %22 = tpu.matmul %20, %21, %cst_9 {dimension_numbers = #tpu.dot_dimension_numbers<[1], [0], [0], [1], [0, 0, 1, 1], [], []>} : vector<8x128xbf16>, vector<128x128xbf16>, vector<8x128xf32> -> vector<8x128xf32>
    %c0_10 = arith.constant 0 : index
    %c0_11 = arith.constant 0 : index
    %23 = vector.load %arg5[%c0_10, %c0_11] : memref<128x128xbf16, #tpu.memory_space<vmem>>, vector<128x128xbf16>
    %cst_12 = arith.constant dense<0.000000e+00> : vector<8x128xf32>
    %24 = tpu.matmul %20, %23, %cst_12 {dimension_numbers = #tpu.dot_dimension_numbers<[1], [0], [0], [1], [0, 0, 1, 1], [], []>} : vector<8x128xbf16>, vector<128x128xbf16>, vector<8x128xf32> -> vector<8x128xf32>
    %25 = arith.addf %22, %24 : vector<8x128xf32>
    %c0_13 = arith.constant 0 : index
    %c0_14 = arith.constant 0 : index
    %26 = vector.load %arg6[%c0_13, %c0_14] : memref<1x128xf32, #tpu.memory_space<vmem>>, vector<1x128xf32>
    %27 = vector.broadcast %26 : vector<1x128xf32> to vector<8x128xf32>
    %28 = arith.addf %25, %27 : vector<8x128xf32>
    %c0_15 = arith.constant 0 : index
    %c0_16 = arith.constant 0 : index
    %29 = vector.load %arg7[%c0_15, %c0_16] : memref<8x128xf32, #tpu.memory_space<vmem>>, vector<8x128xf32>
    tpu.vector_store %arg7[%c0_15, %c0_16], %28 {strides = array<i32>} : memref<8x128xf32, #tpu.memory_space<vmem>>, vector<8x128xf32>,
    return
  }
  func.func @transform_0(%arg0: i32) -> (i32, i32) {
    %c0_i32 = arith.constant 0 : i32
    %c0_i32_0 = arith.constant 0 : i32
    return %arg0, %c0_i32 : i32, i32
  }
  func.func @transform_1(%arg0: i32) -> (i32, i32) {
    %c0_i32 = arith.constant 0 : i32
    %c0_i32_0 = arith.constant 0 : i32
    %c0_i32_1 = arith.constant 0 : i32
    return %c0_i32, %c0_i32_0 : i32, i32
  }
  func.func @transform_2(%arg0: i32) -> (i32, i32) {
    %c0_i32 = arith.constant 0 : i32
    %c0_i32_0 = arith.constant 0 : i32
    %c0_i32_1 = arith.constant 0 : i32
    return %c0_i32, %c0_i32_0 : i32, i32
  }
  func.func @transform_3(%arg0: i32) -> (i32, i32) {
    %c0_i32 = arith.constant 0 : i32
    %c0_i32_0 = arith.constant 0 : i32
    %c0_i32_1 = arith.constant 0 : i32
    return %c0_i32, %c0_i32_0 : i32, i32
  }
  func.func @transform_4(%arg0: i32) -> (i32, i32) {
    %c0_i32 = arith.constant 0 : i32
    %c0_i32_0 = arith.constant 0 : i32
    %c0_i32_1 = arith.constant 0 : i32
    return %c0_i32, %c0_i32_0 : i32, i32
  }
  func.func @transform_5(%arg0: i32) -> (i32, i32) {
    %c0_i32 = arith.constant 0 : i32
    %c0_i32_0 = arith.constant 0 : i32
    %c0_i32_1 = arith.constant 0 : i32
    return %c0_i32, %c0_i32_0 : i32, i32
  }
  func.func @transform_6(%arg0: i32) -> (i32, i32) {
    %c0_i32 = arith.constant 0 : i32
    %c0_i32_0 = arith.constant 0 : i32
    return %arg0, %c0_i32 : i32, i32
  }
}

</mosaic_0001>

<bundles_post_ra>
// kernel: _forward.1
= control target key start
LH: loop header
LB: loop body
LE: loop exit
PB: predicated region body
PF: predicated region fallthrough
CT: control target
= control target key end

     0   :  { %11 = vsyncpa [#allocation3], 0  ;;  %s791_s0 = inlined_call_operand.hbm [shape: f32[8,32], index: 0, kind: input, shape index: {}]   ;;  %s792_s1 = inlined_call_operand.hbm [shape: bf16[32,128], index: 1, kind: input, shape index: {}]   ;;  %s793_s2 = inlined_call_operand.vmem [shape: f32[1,128], index: 2, kind: input, shape index: {}]   ;;  %s794_s3 = inlined_call_operand.hbm [shape: bf16[128,128], index: 3, kind: input, shape index: {}]   ;;  %s795_s4 = inlined_call_operand.hbm [shape: bf16[128,128], index: 4, kind: input, shape index: {}]   ;;  %s796_s5 = inlined_call_operand.vmem [shape: f32[1,128], index: 5, kind: input, shape index: {}]   ;;  %s797_s6 = inlined_call_operand.hbm [shape: f32[8,128], index: 6, kind: output, shape index: {}]  }
   0x1   :  { %12 = vsyncpa [#allocation6], 0 }
   0x2   :  { %13 = vsyncpa [#allocation9], 0 }
   0x3   :  { %14 = vsyncpa [#allocation4], 0  ;;  %s646_s21 = smov [#allocation5]   ;;  %s528_s25 = scalar_lea.hbm %s792_s1, 256 }
   0x4   :  { %s30_s22 = sshll.u32 %s646_s21, 4  ;;  %p529_p0 = scmp.ne.s32.totalorder %s792_s1, %s528_s25  ;;  %s31_s22 = int_to_ptr.vmem [resolvable:$true] %s30_s22 }
   0x5   :  { %p532_p1 = scmp.lt.u32.totalorder %s528_s25, %s792_s1 }
   0x7   :  { %p534_p2 = pnand %p532_p1, %p529_p0 }
   0x9   :  { %537 = shalt.err (!%p534_p2)
}
   0xa   :  { %s538_s30 = scalar_lea.vmem %s31_s22, 256  ;;  %p543_p4 = scmp.lt.s32.totalorder %s31_s22, %s31_s22 }
   0xb   :  { %p539_p3 = scmp.ne.s32.totalorder %s31_s22, %s538_s30  ;;  %p544_p5 = scmp.lt.s32.totalorder %s538_s30, %s538_s30 }
   0xd   :  { %p545_p6 = por %p544_p5, %p543_p4 }
   0xf   :  { %p546_p7 = pnand %p545_p6, %p539_p3 }
  0x11   :  { %549 = shalt.err (!%p546_p7)
}
  0x12   :  { %s647_s7 = smov 64   ;;  %s648_s8 = smov 4  }
  0x13   :  { %36 = dma.hbm_to_vmem [thread:$0]  %s792_s1, 256, %s31_s22, [#allocation6], %s647_s7, %s647_s7, %s648_s8  }
  0x14   :  { %s649_s11 = smov [#allocation2]   ;;  %s650_s13 = smov [#allocation7]  }
  0x15   :  { %s21_s12 = sshll.u32 %s649_s11, 4  ;;  %s44_s14 = sshll.u32 %s650_s13, 4  ;;  %s22_s12 = int_to_ptr.vmem [resolvable:$true] %s21_s12  ;;  %s45_s14 = int_to_ptr.vmem [resolvable:$true] %s44_s14 }
  0x16   :  { %s550_s17 = scalar_lea.hbm %s791_s0, 128 }
  0x17   :  { %p551_p8 = scmp.ne.s32.totalorder %s791_s0, %s550_s17  ;;  %p554_p9 = scmp.lt.u32.totalorder %s550_s17, %s791_s0 }
  0x19   :  { %p556_p10 = pnand %p554_p9, %p551_p8 }
  0x1b   :  { %559 = shalt.err (!%p556_p10)
}
  0x1c   :  { %s560_s1 = scalar_lea.vmem %s22_s12, 128  ;;  %p565_p12 = scmp.lt.s32.totalorder %s22_s12, %s22_s12 }
  0x1d   :  { %p561_p11 = scmp.ne.s32.totalorder %s22_s12, %s560_s1  ;;  %p566_p13 = scmp.lt.s32.totalorder %s560_s1, %s560_s1 }
  0x1f   :  { %p567_p0 = por %p566_p13, %p565_p12 }
  0x21   :  { %p568_p1 = pnand %p567_p0, %p561_p11 }
  0x23   :  { %571 = shalt.err (!%p568_p1)
}
  0x24   :  { %24 = dma.hbm_to_vmem [thread:$0]  %s791_s0, 128, %s22_s12, [#allocation3]  }
  0x25   :  { %s572_s26 = scalar_lea.hbm %s794_s3, 1024 }
  0x26   :  { %p573_p2 = scmp.ne.s32.totalorder %s794_s3, %s572_s26  ;;  %p576_p3 = scmp.lt.u32.totalorder %s572_s26, %s794_s3 }
  0x28   :  { %p578_p4 = pnand %p576_p3, %p573_p2 }
  0x2a   :  { %581 = shalt.err (!%p578_p4)
}
  0x2b   :  { %s582_s9 = scalar_lea.vmem %s45_s14, 1024  ;;  %p587_p6 = scmp.lt.s32.totalorder %s45_s14, %s45_s14 }
  0x2c   :  { %p583_p5 = scmp.ne.s32.totalorder %s45_s14, %s582_s9  ;;  %p588_p7 = scmp.lt.s32.totalorder %s582_s9, %s582_s9 }
  0x2e   :  { %p589_p8 = por %p588_p7, %p587_p6 }
  0x30   :  { %p590_p9 = pnand %p589_p8, %p583_p5 }
  0x32   :  { %593 = shalt.err (!%p590_p9)
}
  0x33   :  { %50 = dma.hbm_to_vmem [thread:$0]  %s794_s3, 1024, %s45_s14, [#allocation6], %s647_s7, %s647_s7, %s648_s8  }
  0x34   :  { %s651_s11 = smov [#allocation8]   ;;  %s594_s16 = scalar_lea.hbm %s795_s4, 1024 }
  0x35   :  { %s56_s12 = sshll.u32 %s651_s11, 4  ;;  %p595_p10 = scmp.ne.s32.totalorder %s795_s4, %s594_s16  ;;  %s57_s12 = int_to_ptr.vmem [resolvable:$true] %s56_s12 }
  0x36   :  { %p598_p11 = scmp.lt.u32.totalorder %s594_s16, %s795_s4 }
  0x38   :  { %p600_p12 = pnand %p598_p11, %p595_p10 }
  0x3a   :  { %603 = shalt.err (!%p600_p12)
}
  0x3b   :  { %s604_s21 = scalar_lea.vmem %s57_s12, 1024  ;;  %p609_p0 = scmp.lt.s32.totalorder %s57_s12, %s57_s12 }
  0x3c   :  { %p605_p13 = scmp.ne.s32.totalorder %s57_s12, %s604_s21  ;;  %p610_p1 = scmp.lt.s32.totalorder %s604_s21, %s604_s21 }
  0x3e   :  { %p611_p2 = por %p610_p1, %p609_p0 }
  0x40   :  { %p612_p3 = pnand %p611_p2, %p605_p13 }
  0x42   :  { %615 = shalt.err (!%p612_p3)
}
  0x43   :  { %62 = dma.hbm_to_vmem [thread:$0]  %s795_s4, 1024, %s57_s12, [#allocation9], %s647_s7, %s647_s7, %s648_s8  }
  0x44   :  { %638 = dma.done.wait [#allocation3], 128  }
  0x45   :  { %639 = vsyncadd [#allocation3], 4294967168 }
  0x46   :  { %640 = dma.done.wait [#allocation6], 1280  }
  0x47   :  { %641 = vsyncadd [#allocation6], 4294966016 }
  0x48   :  { %642 = dma.done.wait [#allocation9], 1024  }
  0x49   :  { %643 = vsyncadd [#allocation9], 4294966272  ;;  %v652_v0 = vmov 0.0   ;;  %vm653_vm0 = vmmov 0   ;;  %v510_v1 = vld [vmem:[#allocation5] sm:$0xff]   ;;  %v511_v2 = vld [vmem:[#allocation5 + $0x8] sm:$0xff]   ;;  %v149_v11 = vlaneseq }
  0x4a   :  { %452 = vmatprep.subr.bf16.mxu0 %v652_v0  ;;  %456 = vmatprep.mubr.msk.bf16.mxu0 %vm653_vm0, %v652_v0  ;;  %v78_v3 = vld [vmem:[#allocation2] sm:$0xff]  ;;  %vm103_vm1 = vcmask 261120   ;;  %v512_v17 = vld [vmem:[#allocation8] sm:$0xff]   ;;  %v516_v21 = vld [vmem:[#allocation8 + $0x10] sm:$0xff]   ;;  %v654_v42 = vmov 1.0|1.0  }
  0x4b   :  { %460 = vmatprep.subr.bf16.mxu1 %v652_v0  ;;  %476 = vmatprep.mubr.msk.bf16.mxu1 %vm653_vm0, %v652_v0  ;;  %v79_v4 = vpack.c.bf16 %v78_v3, %v78_v3  ;;  %v405_v5 = vld [vmem:[%s793_s2] ss:$0 sm:$0xff]  ;;  %v758_v12 = vand.u32 127, %v149_v11  ;;  %v513_v18 = vld [vmem:[#allocation7] sm:$0xff]   ;;  %v517_v22 = vld [vmem:[#allocation7 + $0x10] sm:$0xff]   ;;  %s655_s1 = smov [#allocation10]  }
  0x4c   :  { %453 = vmatpush3.bf16.msra.mxu0 %v510_v1  ;;  %461 = vmatpush3.bf16.msra.mxu1 %v512_v17  ;;  %v514_v19 = vld [vmem:[#allocation8 + $0x8] sm:$0xff]   ;;  %v518_v23 = vld [vmem:[#allocation8 + $0x18] sm:$0xff]   ;;  %v520_v25 = vld [vmem:[#allocation8 + $0x20] sm:$0xff]   ;;  %s394_s22 = sshll.u32 %s655_s1, 4  ;;  %s395_s22 = int_to_ptr.vmem [resolvable:$true] %s394_s22 }
  0x4d   :  { %454 = vmatprep.subr.bf16.mxu0 %v652_v0  ;;  %v515_v20 = vld [vmem:[#allocation7 + $0x8] sm:$0xff]   ;;  %462 = vmatprep.subr.bf16.mxu1 %v652_v0  ;;  %v519_v24 = vld [vmem:[#allocation7 + $0x18] sm:$0xff]   ;;  %v521_v26 = vld [vmem:[#allocation7 + $0x20] sm:$0xff]   ;;  %s616_s23 = scalar_lea.vmem %s395_s22, 128  ;;  %p621_p5 = scmp.lt.s32.totalorder %s395_s22, %s395_s22 }
  0x4e   :  { %v522_v27 = vld [vmem:[#allocation8 + $0x28] sm:$0xff]   ;;  %v524_v29 = vld [vmem:[#allocation8 + $0x30] sm:$0xff]   ;;  %v526_v35 = vld [vmem:[#allocation8 + $0x38] sm:$0xff]   ;;  %p617_p4 = scmp.ne.s32.totalorder %s395_s22, %s616_s23  ;;  %p622_p6 = scmp.lt.s32.totalorder %s616_s23, %s616_s23 }
  0x4f   :  { %v523_v28 = vld [vmem:[#allocation7 + $0x28] sm:$0xff]   ;;  %v525_v30 = vld [vmem:[#allocation7 + $0x30] sm:$0xff]   ;;  %v527_v36 = vld [vmem:[#allocation7 + $0x38] sm:$0xff]  }
  0x50   :  { %455 = vmatpush3.bf16.msra.mxu0 %v511_v2  ;;  %463 = vmatpush3.bf16.msra.mxu1 %v514_v19  ;;  %v430_v45 = vld [vmem:[%s796_s5] ss:$0 sm:$0xff]  ;;  %p623_p7 = por %p622_p6, %p621_p5 }
  0x51   :  { %480 = vmatprep.subr.bf16.mxu0 %v652_v0  ;;  %464 = vmatprep.subr.bf16.mxu1 %v652_v0 }
  0x52   :  { %p624_p8 = pnand %p623_p7, %p617_p4 }
  0x53   :  { %457 = vmatmul.mubr.msk.bf16.vlgmr.msra.gmra.mrb[0].mxu0 %vm103_vm1, %v79_v4 }
  0x54   :  { %496 = vmatprep.mubr.msk.bf16.mxu0 %vm653_vm0, %v652_v0  ;;  %481 = vmatpush3.bf16.msra.mxu0 %v513_v18 }
  0x55   :  { %482 = vmatprep.subr.bf16.mxu0 %v652_v0  ;;  %465 = vmatpush3.bf16.msra.mxu1 %v516_v21 }
  0x56   :  { %466 = vmatprep.subr.bf16.mxu1 %v652_v0 }
  0x58   :  { %483 = vmatpush3.bf16.msra.mxu0 %v515_v20 }
  0x59   :  { %484 = vmatprep.subr.bf16.mxu0 %v652_v0  ;;  %467 = vmatpush3.bf16.msra.mxu1 %v518_v23 }
  0x5a   :  { %468 = vmatprep.subr.bf16.mxu1 %v652_v0 }
  0x5c   :  { %485 = vmatpush3.bf16.msra.mxu0 %v517_v22 }
  0x5d   :  { %486 = vmatprep.subr.bf16.mxu0 %v652_v0  ;;  %469 = vmatpush3.bf16.msra.mxu1 %v520_v25 }
  0x5e   :  { %470 = vmatprep.subr.bf16.mxu1 %v652_v0 }
  0x60   :  { %487 = vmatpush3.bf16.msra.mxu0 %v519_v24 }
  0x61   :  { %488 = vmatprep.subr.bf16.mxu0 %v652_v0  ;;  %471 = vmatpush3.bf16.msra.mxu1 %v522_v27 }
  0x62   :  { %472 = vmatprep.subr.bf16.mxu1 %v652_v0 }
  0x64   :  { %489 = vmatpush3.bf16.msra.mxu0 %v521_v26 }
  0x65   :  { %490 = vmatprep.subr.bf16.mxu0 %v652_v0  ;;  %473 = vmatpush3.bf16.msra.mxu1 %v524_v29 }
  0x66   :  { %474 = vmatprep.subr.bf16.mxu1 %v652_v0 }
  0x68   :  { %491 = vmatpush3.bf16.msra.mxu0 %v523_v28 }
  0x69   :  { %492 = vmatprep.subr.bf16.mxu0 %v652_v0  ;;  %475 = vmatpush3.bf16.msra.mxu1 %v526_v35 }
  0x6c   :  { %493 = vmatpush3.bf16.msra.mxu0 %v525_v30 }
  0x6d   :  { %494 = vmatprep.subr.bf16.mxu0 %v652_v0 }
  0x70   :  { %495 = vmatpush3.bf16.msra.mxu0 %v527_v36 }
 0x126   :  { %v141_v6 = vpop.f32.mrb[0].mxu0 }
 0x127   :  { %v142_v7 = vadd.f32 %v405_v5, %v141_v6  ;;  %v458_v8 = vpop.f32.mrb[1].mxu0 }
 0x128   :  { %v144_v9 = vpop.f32.mrb[2].mxu0 }
 0x129   :  { %147 = vmax.xlane.f32.xlu0 %v142_v7  ;;  %v459_v10 = vpop.f32.mrb[3].mxu0 }
 0x1b6   :  { %v148_v13 = vpop.xlane.xlu0 %147 }
 0x1b7   :  { %vm151_vm2 = vcmp.eq.f32.partialorder %v142_v7, %v148_v13 }
 0x1b8   :  { %v152_v14 = vsel %vm151_vm2, %v758_v12, 128 }
 0x1b9   :  { %v154_v15 = vshra.s32 %v152_v14, 16  ;;  %v153_v31 = vand.u32 65535, %v152_v14 }
 0x1bb   :  { %v156_v16 = vcvt.s32.f32 %v154_v15  ;;  %v155_v33 = vcvt.s32.f32 %v153_v31 }
 0x1bd   :  { %157 = vmin.xlane.f32.xlu0 %v156_v16 }
 0x24a   :  { %v158_v32 = vpop.xlane.xlu0 %157 }
 0x24b   :  { %vm159_vm3 = vcmp.eq.f32.partialorder %v156_v16, %v158_v32  ;;  %v164_v37 = vcvt.f32.s32 %v158_v32 }
 0x24c   :  { %v160_v34 = vsel %vm159_vm3, %v155_v33, inf }
 0x24d   :  { %161 = vmin.xlane.f32.xlu1 %v160_v34  ;;  %v165_v39 = vshll.u32 %v164_v37, 16 }
 0x2da   :  { %v162_v38 = vpop.xlane.xlu1 %161 }
 0x2db   :  { %v163_v40 = vcvt.f32.s32 %v162_v38 }
 0x2dd   :  { %v166_v41 = vadd.s32 %v165_v39, %v163_v40 }
 0x2df   :  { %vm167_vm4 = vcmp.eq.s32.totalorder %v758_v12, %v166_v41 }
 0x2e0   :  { %vm418_vm5 = vmpackc.low %vm167_vm4, %vm167_vm4 }
 0x2e1   :  { %477 = vmatmul.mubr.msk.bf16.vlgmr.msra.gmra.mrb[0].mxu1 %vm418_vm5, %v654_v42  ;;  %497 = vmatmul.mubr.msk.bf16.vlgmr.msra.gmra.mrb[4].mxu0 %vm418_vm5, %v654_v42 }
 0x3b4   :  { %v285_v43 = vpop.f32.mrb[0].mxu1  ;;  %v373_v44 = vpop.f32.mrb[4].mxu0 }
 0x3b5   :  { %v374_v46 = vadd.f32 %v373_v44, %v285_v43  ;;  %v478_v47 = vpop.f32.mrb[1].mxu1  ;;  %v498_v48 = vpop.f32.mrb[5].mxu0 }
 0x3b6   :  { %v288_v49 = vpop.f32.mrb[2].mxu1  ;;  %v376_v50 = vpop.f32.mrb[6].mxu0 }
 0x3b7   :  { %v386_v51 = vadd.f32 %v430_v45, %v374_v46  ;;  %v479_v52 = vpop.f32.mrb[3].mxu1  ;;  %v499_v53 = vpop.f32.mrb[7].mxu0 }
 0x3b9   :  { %387 = vst [vmem:[#allocation10] sm:$0xff] %v386_v51 }
 0x3ba   :  { %627 = shalt.err (!%p624_p8)
}
 0x3bb   :  { %s628_s25 = scalar_lea.hbm %s797_s6, 128 }
 0x3bc   :  { %p629_p9 = scmp.ne.s32.totalorder %s797_s6, %s628_s25  ;;  %p632_p10 = scmp.lt.u32.totalorder %s628_s25, %s797_s6 }
 0x3be   :  { %p634_p11 = pnand %p632_p10, %p629_p9 }
 0x3c0   :  { %637 = shalt.err (!%p634_p11)
}
 0x3c1   :  { %397 = dma.vmem_to_hbm [thread:$0]  %s395_s22, 128, %s797_s6, [#allocation4]  }
 0x3c2   :  { %644 = dma.done.wait [#allocation4], 128  }
 0x3c3   :  { %645 = vsyncadd [#allocation4], 4294967168 }
 0x3c4   :  { %401 = vsyncpa [#allocation3], 1 }
 0x3c5   :  { %402 = vsyncpa [#allocation6], 1 }
 0x3c6   :  { %403 = vsyncpa [#allocation9], 1 }
 0x3c7   :  { %404 = vsyncpa [#allocation4], 1 }

// kernel: _forward.1
= control target key start
LH: loop header
LB: loop body
LE: loop exit
PB: predicated region body
PF: predicated region fallthrough
CT: control target
= control target key end

     0   :  { %11 = vsyncpa [#allocation3], 0  ;;  %s791_s0 = inlined_call_operand.hbm [shape: f32[8,32], index: 0, kind: input, shape index: {}]   ;;  %s792_s1 = inlined_call_operand.hbm [shape: bf16[32,128], index: 1, kind: input, shape index: {}]   ;;  %s793_s2 = inlined_call_operand.vmem [shape: f32[1,128], index: 2, kind: input, shape index: {}]   ;;  %s794_s3 = inlined_call_operand.hbm [shape: bf16[128,128], index: 3, kind: input, shape index: {}]   ;;  %s795_s4 = inlined_call_operand.hbm [shape: bf16[128,128], index: 4, kind: input, shape index: {}]   ;;  %s796_s5 = inlined_call_operand.vmem [shape: f32[1,128], index: 5, kind: input, shape index: {}]   ;;  %s797_s6 = inlined_call_operand.hbm [shape: f32[8,128], index: 6, kind: output, shape index: {}]  }
   0x1   :  { %12 = vsyncpa [#allocation6], 0 }
   0x2   :  { %13 = vsyncpa [#allocation9], 0 }
   0x3   :  { %14 = vsyncpa [#allocation4], 0  ;;  %s646_s21 = smov [#allocation5]   ;;  %s528_s25 = scalar_lea.hbm %s792_s1, 256 }
   0x4   :  { %s30_s22 = sshll.u32 %s646_s21, 4  ;;  %p529_p0 = scmp.ne.s32.totalorder %s792_s1, %s528_s25  ;;  %s31_s22 = int_to_ptr.vmem [resolvable:$true] %s30_s22 }
   0x5   :  { %p532_p1 = scmp.lt.u32.totalorder %s528_s25, %s792_s1 }
   0x7   :  { %p534_p2 = pnand %p532_p1, %p529_p0 }
   0x9   :  { %537 = shalt.err (!%p534_p2)
}
   0xa   :  { %s538_s30 = scalar_lea.vmem %s31_s22, 256  ;;  %p543_p4 = scmp.lt.s32.totalorder %s31_s22, %s31_s22 }
   0xb   :  { %p539_p3 = scmp.ne.s32.totalorder %s31_s22, %s538_s30  ;;  %p544_p5 = scmp.lt.s32.totalorder %s538_s30, %s538_s30 }
   0xd   :  { %p545_p6 = por %p544_p5, %p543_p4 }
   0xf   :  { %p546_p7 = pnand %p545_p6, %p539_p3 }
  0x11   :  { %549 = shalt.err (!%p546_p7)
}
  0x12   :  { %s647_s7 = smov 64   ;;  %s648_s8 = smov 4  }
  0x13   :  { %36 = dma.hbm_to_vmem [thread:$0]  %s792_s1, 256, %s31_s22, [#allocation6], %s647_s7, %s647_s7, %s648_s8  }
  0x14   :  { %s649_s11 = smov [#allocation2]   ;;  %s650_s13 = smov [#allocation7]  }
  0x15   :  { %s21_s12 = sshll.u32 %s649_s11, 4  ;;  %s44_s14 = sshll.u32 %s650_s13, 4  ;;  %s22_s12 = int_to_ptr.vmem [resolvable:$true] %s21_s12  ;;  %s45_s14 = int_to_ptr.vmem [resolvable:$true] %s44_s14 }
  0x16   :  { %s550_s17 = scalar_lea.hbm %s791_s0, 128 }
  0x17   :  { %p551_p8 = scmp.ne.s32.totalorder %s791_s0, %s550_s17  ;;  %p554_p9 = scmp.lt.u32.totalorder %s550_s17, %s791_s0 }
  0x19   :  { %p556_p10 = pnand %p554_p9, %p551_p8 }
  0x1b   :  { %559 = shalt.err (!%p556_p10)
}
  0x1c   :  { %s560_s1 = scalar_lea.vmem %s22_s12, 128  ;;  %p565_p12 = scmp.lt.s32.totalorder %s22_s12, %s22_s12 }
  0x1d   :  { %p561_p11 = scmp.ne.s32.totalorder %s22_s12, %s560_s1  ;;  %p566_p13 = scmp.lt.s32.totalorder %s560_s1, %s560_s1 }
  0x1f   :  { %p567_p0 = por %p566_p13, %p565_p12 }
  0x21   :  { %p568_p1 = pnand %p567_p0, %p561_p11 }
  0x23   :  { %571 = shalt.err (!%p568_p1)
}
  0x24   :  { %24 = dma.hbm_to_vmem [thread:$0]  %s791_s0, 128, %s22_s12, [#allocation3]  }
  0x25   :  { %s572_s26 = scalar_lea.hbm %s794_s3, 1024 }
  0x26   :  { %p573_p2 = scmp.ne.s32.totalorder %s794_s3, %s572_s26  ;;  %p576_p3 = scmp.lt.u32.totalorder %s572_s26, %s794_s3 }
  0x28   :  { %p578_p4 = pnand %p576_p3, %p573_p2 }
  0x2a   :  { %581 = shalt.err (!%p578_p4)
}
  0x2b   :  { %s582_s9 = scalar_lea.vmem %s45_s14, 1024  ;;  %p587_p6 = scmp.lt.s32.totalorder %s45_s14, %s45_s14 }
  0x2c   :  { %p583_p5 = scmp.ne.s32.totalorder %s45_s14, %s582_s9  ;;  %p588_p7 = scmp.lt.s32.totalorder %s582_s9, %s582_s9 }
  0x2e   :  { %p589_p8 = por %p588_p7, %p587_p6 }
  0x30   :  { %p590_p9 = pnand %p589_p8, %p583_p5 }
  0x32   :  { %593 = shalt.err (!%p590_p9)
}
  0x33   :  { %50 = dma.hbm_to_vmem [thread:$0]  %s794_s3, 1024, %s45_s14, [#allocation6], %s647_s7, %s647_s7, %s648_s8  }
  0x34   :  { %s651_s11 = smov [#allocation8]   ;;  %s594_s16 = scalar_lea.hbm %s795_s4, 1024 }
  0x35   :  { %s56_s12 = sshll.u32 %s651_s11, 4  ;;  %p595_p10 = scmp.ne.s32.totalorder %s795_s4, %s594_s16  ;;  %s57_s12 = int_to_ptr.vmem [resolvable:$true] %s56_s12 }
  0x36   :  { %p598_p11 = scmp.lt.u32.totalorder %s594_s16, %s795_s4 }
  0x38   :  { %p600_p12 = pnand %p598_p11, %p595_p10 }
  0x3a   :  { %603 = shalt.err (!%p600_p12)
}
  0x3b   :  { %s604_s21 = scalar_lea.vmem %s57_s12, 1024  ;;  %p609_p0 = scmp.lt.s32.totalorder %s57_s12, %s57_s12 }
  0x3c   :  { %p605_p13 = scmp.ne.s32.totalorder %s57_s12, %s604_s21  ;;  %p610_p1 = scmp.lt.s32.totalorder %s604_s21, %s604_s21 }
  0x3e   :  { %p611_p2 = por %p610_p1, %p609_p0 }
  0x40   :  { %p612_p3 = pnand %p611_p2, %p605_p13 }
  0x42   :  { %615 = shalt.err (!%p612_p3)
}
  0x43   :  { %62 = dma.hbm_to_vmem [thread:$0]  %s795_s4, 1024, %s57_s12, [#allocation9], %s647_s7, %s647_s7, %s648_s8  }
  0x44   :  { %638 = dma.done.wait [#allocation3], 128  }
  0x45   :  { %639 = vsyncadd [#allocation3], 4294967168 }
  0x46   :  { %640 = dma.done.wait [#allocation6], 1280  }
  0x47   :  { %641 = vsyncadd [#allocation6], 4294966016 }
  0x48   :  { %642 = dma.done.wait [#allocation9], 1024  }
  0x49   :  { %643 = vsyncadd [#allocation9], 4294966272  ;;  %v652_v0 = vmov 0.0   ;;  %vm653_vm0 = vmmov 0   ;;  %v510_v1 = vld [vmem:[#allocation5] sm:$0xff]   ;;  %v511_v2 = vld [vmem:[#allocation5 + $0x8] sm:$0xff]   ;;  %v149_v11 = vlaneseq }
  0x4a   :  { %452 = vmatprep.subr.bf16.mxu0 %v652_v0  ;;  %456 = vmatprep.mubr.msk.bf16.mxu0 %vm653_vm0, %v652_v0  ;;  %v78_v3 = vld [vmem:[#allocation2] sm:$0xff]  ;;  %vm103_vm1 = vcmask 261120   ;;  %v512_v17 = vld [vmem:[#allocation8] sm:$0xff]   ;;  %v516_v21 = vld [vmem:[#allocation8 + $0x10] sm:$0xff]   ;;  %v654_v42 = vmov 1.0|1.0  }
  0x4b   :  { %460 = vmatprep.subr.bf16.mxu1 %v652_v0  ;;  %476 = vmatprep.mubr.msk.bf16.mxu1 %vm653_vm0, %v652_v0  ;;  %v79_v4 = vpack.c.bf16 %v78_v3, %v78_v3  ;;  %v405_v5 = vld [vmem:[%s793_s2] ss:$0 sm:$0xff]  ;;  %v758_v12 = vand.u32 127, %v149_v11  ;;  %v513_v18 = vld [vmem:[#allocation7] sm:$0xff]   ;;  %v517_v22 = vld [vmem:[#allocation7 + $0x10] sm:$0xff]   ;;  %s655_s1 = smov [#allocation10]  }
  0x4c   :  { %453 = vmatpush3.bf16.msra.mxu0 %v510_v1  ;;  %461 = vmatpush3.bf16.msra.mxu1 %v512_v17  ;;  %v514_v19 = vld [vmem:[#allocation8 + $0x8] sm:$0xff]   ;;  %v518_v23 = vld [vmem:[#allocation8 + $0x18] sm:$0xff]   ;;  %v520_v25 = vld [vmem:[#allocation8 + $0x20] sm:$0xff]   ;;  %s394_s22 = sshll.u32 %s655_s1, 4  ;;  %s395_s22 = int_to_ptr.vmem [resolvable:$true] %s394_s22 }
  0x4d   :  { %454 = vmatprep.subr.bf16.mxu0 %v652_v0  ;;  %v515_v20 = vld [vmem:[#allocation7 + $0x8] sm:$0xff]   ;;  %462 = vmatprep.subr.bf16.mxu1 %v652_v0  ;;  %v519_v24 = vld [vmem:[#allocation7 + $0x18] sm:$0xff]   ;;  %v521_v26 = vld [vmem:[#allocation7 + $0x20] sm:$0xff]   ;;  %s616_s23 = scalar_lea.vmem %s395_s22, 128  ;;  %p621_p5 = scmp.lt.s32.totalorder %s395_s22, %s395_s22 }
  0x4e   :  { %v522_v27 = vld [vmem:[#allocation8 + $0x28] sm:$0xff]   ;;  %v524_v29 = vld [vmem:[#allocation8 + $0x30] sm:$0xff]   ;;  %v526_v35 = vld [vmem:[#allocation8 + $0x38] sm:$0xff]   ;;  %p617_p4 = scmp.ne.s32.totalorder %s395_s22, %s616_s23  ;;  %p622_p6 = scmp.lt.s32.totalorder %s616_s23, %s616_s23 }
  0x4f   :  { %v523_v28 = vld [vmem:[#allocation7 + $0x28] sm:$0xff]   ;;  %v525_v30 = vld [vmem:[#allocation7 + $0x30] sm:$0xff]   ;;  %v527_v36 = vld [vmem:[#allocation7 + $0x38] sm:$0xff]  }
  0x50   :  { %455 = vmatpush3.bf16.msra.mxu0 %v511_v2  ;;  %463 = vmatpush3.bf16.msra.mxu1 %v514_v19  ;;  %v430_v45 = vld [vmem:[%s796_s5] ss:$0 sm:$0xff]  ;;  %p623_p7 = por %p622_p6, %p621_p5 }
  0x51   :  { %480 = vmatprep.subr.bf16.mxu0 %v652_v0  ;;  %464 = vmatprep.subr.bf16.mxu1 %v652_v0 }
  0x52   :  { %p624_p8 = pnand %p623_p7, %p617_p4 }
  0x53   :  { %457 = vmatmul.mubr.msk.bf16.vlgmr.msra.gmra.mrb[0].mxu0 %vm103_vm1, %v79_v4 }
  0x54   :  { %496 = vmatprep.mubr.msk.bf16.mxu0 %vm653_vm0, %v652_v0  ;;  %481 = vmatpush3.bf16.msra.mxu0 %v513_v18 }
  0x55   :  { %482 = vmatprep.subr.bf16.mxu0 %v652_v0  ;;  %465 = vmatpush3.bf16.msra.mxu1 %v516_v21 }
  0x56   :  { %466 = vmatprep.subr.bf16.mxu1 %v652_v0 }
  0x58   :  { %483 = vmatpush3.bf16.msra.mxu0 %v515_v20 }
  0x59   :  { %484 = vmatprep.subr.bf16.mxu0 %v652_v0  ;;  %467 = vmatpush3.bf16.msra.mxu1 %v518_v23 }
  0x5a   :  { %468 = vmatprep.subr.bf16.mxu1 %v652_v0 }
  0x5c   :  { %485 = vmatpush3.bf16.msra.mxu0 %v517_v22 }
  0x5d   :  { %486 = vmatprep.subr.bf16.mxu0 %v652_v0  ;;  %469 = vmatpush3.bf16.msra.mxu1 %v520_v25 }
  0x5e   :  { %470 = vmatprep.subr.bf16.mxu1 %v652_v0 }
  0x60   :  { %487 = vmatpush3.bf16.msra.mxu0 %v519_v24 }
  0x61   :  { %488 = vmatprep.subr.bf16.mxu0 %v652_v0  ;;  %471 = vmatpush3.bf16.msra.mxu1 %v522_v27 }
  0x62   :  { %472 = vmatprep.subr.bf16.mxu1 %v652_v0 }
  0x64   :  { %489 = vmatpush3.bf16.msra.mxu0 %v521_v26 }
  0x65   :  { %490 = vmatprep.subr.bf16.mxu0 %v652_v0  ;;  %473 = vmatpush3.bf16.msra.mxu1 %v524_v29 }
  0x66   :  { %474 = vmatprep.subr.bf16.mxu1 %v652_v0 }
  0x68   :  { %491 = vmatpush3.bf16.msra.mxu0 %v523_v28 }
  0x69   :  { %492 = vmatprep.subr.bf16.mxu0 %v652_v0  ;;  %475 = vmatpush3.bf16.msra.mxu1 %v526_v35 }
  0x6c   :  { %493 = vmatpush3.bf16.msra.mxu0 %v525_v30 }
  0x6d   :  { %494 = vmatprep.subr.bf16.mxu0 %v652_v0 }
  0x70   :  { %495 = vmatpush3.bf16.msra.mxu0 %v527_v36 }
 0x126   :  { %v141_v6 = vpop.f32.mrb[0].mxu0 }
 0x127   :  { %v142_v7 = vadd.f32 %v405_v5, %v141_v6  ;;  %v458_v8 = vpop.f32.mrb[1].mxu0 }
 0x128   :  { %v144_v9 = vpop.f32.mrb[2].mxu0 }
 0x129   :  { %147 = vmax.xlane.f32.xlu0 %v142_v7  ;;  %v459_v10 = vpop.f32.mrb[3].mxu0 }
 0x1b6   :  { %v148_v13 = vpop.xlane.xlu0 %147 }
 0x1b7   :  { %vm151_vm2 = vcmp.eq.f32.partialorder %v142_v7, %v148_v13 }
 0x1b8   :  { %v152_v14 = vsel %vm151_vm2, %v758_v12, 128 }
 0x1b9   :  { %v154_v15 = vshra.s32 %v152_v14, 16  ;;  %v153_v31 = vand.u32 65535, %v152_v14 }
 0x1bb   :  { %v156_v16 = vcvt.s32.f32 %v154_v15  ;;  %v155_v33 = vcvt.s32.f32 %v153_v31 }
 0x1bd   :  { %157 = vmin.xlane.f32.xlu0 %v156_v16 }
 0x24a   :  { %v158_v32 = vpop.xlane.xlu0 %157 }
 0x24b   :  { %vm159_vm3 = vcmp.eq.f32.partialorder %v156_v16, %v158_v32  ;;  %v164_v37 = vcvt.f32.s32 %v158_v32 }
 0x24c   :  { %v160_v34 = vsel %vm159_vm3, %v155_v33, inf }
 0x24d   :  { %161 = vmin.xlane.f32.xlu1 %v160_v34  ;;  %v165_v39 = vshll.u32 %v164_v37, 16 }
 0x2da   :  { %v162_v38 = vpop.xlane.xlu1 %161 }
 0x2db   :  { %v163_v40 = vcvt.f32.s32 %v162_v38 }
 0x2dd   :  { %v166_v41 = vadd.s32 %v165_v39, %v163_v40 }
 0x2df   :  { %vm167_vm4 = vcmp.eq.s32.totalorder %v758_v12, %v166_v41 }
 0x2e0   :  { %vm418_vm5 = vmpackc.low %vm167_vm4, %vm167_vm4 }
 0x2e1   :  { %477 = vmatmul.mubr.msk.bf16.vlgmr.msra.gmra.mrb[0].mxu1 %vm418_vm5, %v654_v42  ;;  %497 = vmatmul.mubr.msk.bf16.vlgmr.msra.gmra.mrb[4].mxu0 %vm418_vm5, %v654_v42 }
 0x3b4   :  { %v285_v43 = vpop.f32.mrb[0].mxu1  ;;  %v373_v44 = vpop.f32.mrb[4].mxu0 }
 0x3b5   :  { %v374_v46 = vadd.f32 %v373_v44, %v285_v43  ;;  %v478_v47 = vpop.f32.mrb[1].mxu1  ;;  %v498_v48 = vpop.f32.mrb[5].mxu0 }
 0x3b6   :  { %v288_v49 = vpop.f32.mrb[2].mxu1  ;;  %v376_v50 = vpop.f32.mrb[6].mxu0 }
 0x3b7   :  { %v386_v51 = vadd.f32 %v430_v45, %v374_v46  ;;  %v479_v52 = vpop.f32.mrb[3].mxu1  ;;  %v499_v53 = vpop.f32.mrb[7].mxu0 }
 0x3b9   :  { %387 = vst [vmem:[#allocation10] sm:$0xff] %v386_v51 }
 0x3ba   :  { %627 = shalt.err (!%p624_p8)
}
 0x3bb   :  { %s628_s25 = scalar_lea.hbm %s797_s6, 128 }
 0x3bc   :  { %p629_p9 = scmp.ne.s32.totalorder %s797_s6, %s628_s25  ;;  %p632_p10 = scmp.lt.u32.totalorder %s628_s25, %s797_s6 }
 0x3be   :  { %p634_p11 = pnand %p632_p10, %p629_p9 }
 0x3c0   :  { %637 = shalt.err (!%p634_p11)
}
 0x3c1   :  { %397 = dma.vmem_to_hbm [thread:$0]  %s395_s22, 128, %s797_s6, [#allocation4]  }
 0x3c2   :  { %644 = dma.done.wait [#allocation4], 128  }
 0x3c3   :  { %645 = vsyncadd [#allocation4], 4294967168 }
 0x3c4   :  { %401 = vsyncpa [#allocation3], 1 }
 0x3c5   :  { %402 = vsyncpa [#allocation6], 1 }
 0x3c6   :  { %403 = vsyncpa [#allocation9], 1 }
 0x3c7   :  { %404 = vsyncpa [#allocation4], 1 }

</bundles_post_ra>
